<compile_context>
chip_gen: v7x
topology: tpu7x:2x2x1
jax: 0.10.0
libtpu: 0.0.40
codegen_flags: <defaults>
</compile_context>

<pallas_src>
import functools

import jax
import jax.numpy as jnp
from jax.experimental import pallas as pl
from jax.experimental.pallas import tpu as pltpu

LANES = 128
CHUNK_ROWS = 512                        # in-kernel sub-block: 512x128 f32 = 256 KiB/array
BLOCK_BYTES_DEFAULT = 4 * 1024 * 1024   # per-input DMA block (HBM-streaming budget)
VMEM_LIMIT_BYTES = 32 * 1024 * 1024     # explicit cap, safe on v5e / v6e / v7x


def _round_up(x, m):
    return ((x + m - 1) // m) * m


def _num_parallel_splits():
    """Use a 2-way leading 'parallel' split only on multi-TensorCore chips."""
    try:
        kind = jax.devices()[0].device_kind.lower()
    except Exception:
        return 1
    return 2 if ("v7" in kind or "7x" in kind) else 1


def _dice_kernel(x_ref, t_ref, prod_ref, sum_ref, *, tile_rows, chunk_rows,
                 tiles_per_split, rows_valid, need_mask):
    p = pl.program_id(0)   # parallel split
    j = pl.program_id(1)   # reduction step within this split

    @pl.when(j == 0)
    def _():
        prod_ref[...] = jnp.zeros_like(prod_ref)
        sum_ref[...] = jnp.zeros_like(sum_ref)

    base = (p * tiles_per_split + j) * tile_rows   # logical first row of this tile
    nchunks = tile_rows // chunk_rows

    def chunk_partial(off, masked):
        xc = x_ref[pl.ds(off, chunk_rows), :].astype(jnp.float32)
        tc = t_ref[pl.ds(off, chunk_rows), :].astype(jnp.float32)
        if masked:
            # Mask BEFORE multiply/add: garbage rows (partial / clamped DMA
            # blocks) never enter the arithmetic.
            row_ids = base + off + jax.lax.broadcasted_iota(jnp.int32, xc.shape, 0)
            valid = row_ids < rows_valid
            xc = jnp.where(valid, xc, 0.0)
            tc = jnp.where(valid, tc, 0.0)
        # Keep the reduction vreg-shaped (pure VPU): (chunk,128) -> (8,128).
        pp = (xc * tc).reshape(chunk_rows // 8, 8, LANES).sum(axis=0)
        ss = (xc + tc).reshape(chunk_rows // 8, 8, LANES).sum(axis=0)
        return pp, ss

    def accumulate(masked):
        if nchunks == 1:
            pp, ss = chunk_partial(0, masked)
        else:
            def body(c, carry):
                acc_p, acc_s = carry
                off = pl.multiple_of(c * chunk_rows, chunk_rows)
                pp_c, ss_c = chunk_partial(off, masked)
                return acc_p + pp_c, acc_s + ss_c
            zero = jnp.zeros((8, LANES), jnp.float32)
            pp, ss = jax.lax.fori_loop(0, nchunks, body, (zero, zero))
        prod_ref[...] += pp    # partial of sum(x * t)
        sum_ref[...] += ss     # partial of sum(x) + sum(t)

    if need_mask:
        # Only the overhanging / clamped tiles pay for the mask.
        is_edge = base + tile_rows > rows_valid

        @pl.when(is_edge)
        def _():
            accumulate(masked=True)

        @pl.when(jnp.logical_not(is_edge))
        def _():
            accumulate(masked=False)
    else:
        accumulate(masked=False)


def dice_loss(inputs, targets, smooth=1.0, block_bytes=BLOCK_BYTES_DEFAULT):
    """Pallas implementation of DiceLoss.forward (scalar float32 result)."""
    x = jnp.reshape(inputs, (-1,))
    t = jnp.reshape(targets, (-1,))
    # bool masks: stream as int8 (kernel upcasts per chunk), not f32.
    if x.dtype == jnp.bool_:
        x = x.astype(jnp.int8)
    if t.dtype == jnp.bool_:
        t = t.astype(jnp.int8)
    n = x.shape[0]

    # 128-aligned prefix goes through the kernel; the <128-element tail is
    # folded into the final scalar combine in plain JAX (no jnp.pad copy).
    n_main = (n // LANES) * LANES
    rows = n_main // LANES

    if n_main < n:
        x_tail = x[n_main:].astype(jnp.float32)
        t_tail = t[n_main:].astype(jnp.float32)
        tail_inter = jnp.sum(x_tail * t_tail)
        tail_total = jnp.sum(x_tail) + jnp.sum(t_tail)
    else:
        tail_inter = jnp.zeros((), jnp.float32)
        tail_total = jnp.zeros((), jnp.float32)

    if rows == 0:   # fewer than 128 elements total: plain JAX is enough.
        dice = (2.0 * tail_inter + smooth) / (tail_total + smooth)
        return 1.0 - dice

    x2 = x[:n_main].reshape(rows, LANES)
    t2 = t[:n_main].reshape(rows, LANES)

    # Sublane granularity: 8 for 4-byte, 16 for 2-byte, 32 for 1-byte dtypes.
    gran = max(8, 32 // x2.dtype.itemsize, 32 // t2.dtype.itemsize)
    itemsize = max(x2.dtype.itemsize, t2.dtype.itemsize)

    if rows <= CHUNK_ROWS:
        tile_rows = _round_up(rows, gran)
        chunk_rows = tile_rows
    else:
        chunk_rows = CHUNK_ROWS
        budget_rows = max(
            chunk_rows,
            (block_bytes // (LANES * itemsize)) // chunk_rows * chunk_rows)
        tile_rows = min(budget_rows, _round_up(rows, chunk_rows))

    tiles_total = pl.cdiv(rows, tile_rows)
    splits_cap = _num_parallel_splits()
    splits = splits_cap if tiles_total >= splits_cap else 1
    tiles_per_split = pl.cdiv(tiles_total, splits)
    capacity_rows = splits * tiles_per_split * tile_rows
    need_mask = capacity_rows != rows

    def in_index_map(p, j):
        # Clamp so tiles past the end (overhang / uneven split) re-read an
        # in-bounds block; their contribution is zeroed by the in-kernel mask.
        return (jnp.minimum(p * tiles_per_split + j, tiles_total - 1), 0)

    kernel = functools.partial(
        _dice_kernel,
        tile_rows=tile_rows,
        chunk_rows=chunk_rows,
        tiles_per_split=tiles_per_split,
        rows_valid=rows,
        need_mask=need_mask,
    )

    out_prod, out_sum = pl.pallas_call(
        kernel,
        out_shape=(
            jax.ShapeDtypeStruct((splits, 8, LANES), jnp.float32),
            jax.ShapeDtypeStruct((splits, 8, LANES), jnp.float32),
        ),
        grid_spec=pltpu.PrefetchScalarGridSpec(
            num_scalar_prefetch=0,
            grid=(splits, tiles_per_split),
            in_specs=[
                pl.BlockSpec((tile_rows, LANES), in_index_map),
                pl.BlockSpec((tile_rows, LANES), in_index_map),
            ],
            out_specs=[
                pl.BlockSpec((None, 8, LANES), lambda p, j: (p, 0, 0)),
                pl.BlockSpec((None, 8, LANES), lambda p, j: (p, 0, 0)),
            ],
        ),
        compiler_params=pltpu.CompilerParams(
            dimension_semantics=("parallel", "arbitrary"),
            vmem_limit_bytes=VMEM_LIMIT_BYTES,
        ),
    )(x2, t2)

    intersection = jnp.sum(out_prod) + tail_inter
    total = jnp.sum(out_sum) + tail_total   # sum(x) + sum(t)
    dice = (2.0 * intersection + smooth) / (total + smooth)
    return 1.0 - dice


def dice_loss_ref(inputs, targets, smooth=1.0):
    x = jnp.reshape(inputs, (-1,)).astype(jnp.float32)
    t = jnp.reshape(targets, (-1,)).astype(jnp.float32)
    intersection = jnp.sum(x * t)
    dice = (2.0 * intersection + smooth) / (jnp.sum(x) + jnp.sum(t) + smooth)
    return 1.0 - dice


if __name__ == "__main__":
    key = jax.random.PRNGKey(0)

    def run_case(k, shape, in_dtype=jnp.float32, **kw):
        k1, k2 = jax.random.split(k)
        inputs = jax.nn.sigmoid(
            jax.random.normal(k1, shape, jnp.float32)).astype(in_dtype)
        targets = (jax.random.uniform(k2, shape) > 0.5).astype(jnp.float32)
        loss = jax.block_until_ready(dice_loss(inputs, targets, smooth=1.0, **kw))
        ref = jax.block_until_ready(dice_loss_ref(inputs, targets, smooth=1.0))
        assert jnp.allclose(loss, ref, atol=1e-5, rtol=1e-4), (
            shape, in_dtype, loss, ref)

    keys = jax.random.split(key, 6)
    # Primary NCHW case (exact lane multiple, single tile, unmasked fast path).
    run_case(keys[0], (2, 4, 16, 16))
    # Ragged case: plain-JAX tail + masked partial tile in the kernel.
    run_case(keys[1], (2, 3, 17, 13))
    # bf16 inputs streamed in native dtype (16-row sublane granularity).
    run_case(keys[2], (2, 4, 16, 16), in_dtype=jnp.bfloat16)
    # Single large tile reduced via 3 in-kernel 512-row chunks (fast path).
    run_case(keys[3], (2, 4, 128, 192))
    # Small block budget to exercise the multi-tile grid reduction.
    run_case(keys[4], (2, 4, 128, 192), block_bytes=256 * 1024)
    # Masked edge tile whose valid rows end mid-chunk (chunked + masked path).
    run_case(keys[5], (2, 4, 100, 100))

    # bool targets streamed as int8 (1-byte blocks, 32-row granularity).
    kb1, kb2 = jax.random.split(keys[0])
    b_inputs = jax.nn.sigmoid(jax.random.normal(kb1, (2, 4, 16, 16), jnp.float32))
    b_targets = jax.random.uniform(kb2, (2, 4, 16, 16)) > 0.5
    b_loss = jax.block_until_ready(dice_loss(b_inputs, b_targets, smooth=1.0))
    b_ref = dice_loss_ref(b_inputs, b_targets.astype(jnp.float32))
    assert jnp.allclose(b_loss, b_ref, atol=1e-5, rtol=1e-4), (b_loss, b_ref)

    print("KERNEL_OK")
</pallas_src>

<mosaic_0001>
module attributes {stable_mosaic.version = 11 : i64} {
  func.func @_dice_kernel(%arg0: i32, %arg1: i32, %arg2: memref<16x128xf32, #tpu.memory_space<vmem>>, %arg3: memref<16x128xf32, #tpu.memory_space<vmem>>, %arg4: memref<1x8x128xf32, #tpu.memory_space<vmem>>, %arg5: memref<1x8x128xf32, #tpu.memory_space<vmem>>) attributes {dimension_semantics = [#tpu.dimension_semantics<parallel>, #tpu.dimension_semantics<arbitrary>], iteration_bounds = array<i64: 1, 1>, scalar_prefetch = 0 : i64, scratch_operands = 0 : i64, tpu.core_type = #tpu.core_type<tc>, window_params = [{transform_indices = @transform_0, window_bounds = array<i64: 16, 128>}, {transform_indices = @transform_1, window_bounds = array<i64: 16, 128>}, {transform_indices = @transform_2, window_bounds = array<i64: 1, 8, 128>}, {transform_indices = @transform_3, window_bounds = array<i64: 1, 8, 128>}]} {
    %c0_i32 = arith.constant 0 : i32
    %0 = arith.cmpi eq, %arg1, %c0_i32 : i32
    %1 = arith.extui %0 : i1 to i32
    %c0_i32_0 = arith.constant 0 : i32
    %2 = arith.cmpi ne, %1, %c0_i32_0 : i32
    scf.if %2 {
      %cst_17 = arith.constant 0.000000e+00 : f32
      %23 = vector.broadcast %cst_17 : f32 to vector<8x128xf32>
      %c0_18 = arith.constant 0 : index
      %c0_19 = arith.constant 0 : index
      %c0_20 = arith.constant 0 : index
      %24 = vector.load %arg4[%c0_18, %c0_19, %c0_20] : memref<1x8x128xf32, #tpu.memory_space<vmem>>, vector<1x8x128xf32>
      %25 = vector.shape_cast %24 : vector<1x8x128xf32> to vector<8x128xf32>
      %26 = vector.shape_cast %23 : vector<8x128xf32> to vector<1x8x128xf32>
      tpu.vector_store %arg4[%c0_18, %c0_19, %c0_20], %26 {strides = array<i32>} : memref<1x8x128xf32, #tpu.memory_space<vmem>>, vector<1x8x128xf32>,
      %cst_21 = arith.constant 0.000000e+00 : f32
      %27 = vector.broadcast %cst_21 : f32 to vector<8x128xf32>
      %c0_22 = arith.constant 0 : index
      %c0_23 = arith.constant 0 : index
      %c0_24 = arith.constant 0 : index
      %28 = vector.load %arg5[%c0_22, %c0_23, %c0_24] : memref<1x8x128xf32, #tpu.memory_space<vmem>>, vector<1x8x128xf32>
      %29 = vector.shape_cast %28 : vector<1x8x128xf32> to vector<8x128xf32>
      %30 = vector.shape_cast %27 : vector<8x128xf32> to vector<1x8x128xf32>
      tpu.vector_store %arg5[%c0_22, %c0_23, %c0_24], %30 {strides = array<i32>} : memref<1x8x128xf32, #tpu.memory_space<vmem>>, vector<1x8x128xf32>,
    } else {
    }
    %c0 = arith.constant 0 : index
    %c0_1 = arith.constant 0 : index
    %3 = vector.load %arg2[%c0, %c0_1] : memref<16x128xf32, #tpu.memory_space<vmem>>, vector<16x128xf32>
    %c0_2 = arith.constant 0 : index
    %c0_3 = arith.constant 0 : index
    %4 = vector.load %arg3[%c0_2, %c0_3] : memref<16x128xf32, #tpu.memory_space<vmem>>, vector<16x128xf32>
    %5 = arith.mulf %3, %4 : vector<16x128xf32>
    %6 = vector.shape_cast %5 : vector<16x128xf32> to vector<2x8x128xf32>
    %cst = arith.constant dense<0.000000e+00> : vector<8x128xf32>
    %7 = vector.multi_reduction <add>, %6, %cst [0] : vector<2x8x128xf32> to vector<8x128xf32>
    %8 = arith.addf %3, %4 : vector<16x128xf32>
    %9 = vector.shape_cast %8 : vector<16x128xf32> to vector<2x8x128xf32>
    %cst_4 = arith.constant dense<0.000000e+00> : vector<8x128xf32>
    %10 = vector.multi_reduction <add>, %9, %cst_4 [0] : vector<2x8x128xf32> to vector<8x128xf32>
    %c0_5 = arith.constant 0 : index
    %c0_6 = arith.constant 0 : index
    %c0_7 = arith.constant 0 : index
    %11 = vector.load %arg4[%c0_5, %c0_6, %c0_7] : memref<1x8x128xf32, #tpu.memory_space<vmem>>, vector<1x8x128xf32>
    %12 = vector.shape_cast %11 : vector<1x8x128xf32> to vector<8x128xf32>
    %13 = arith.addf %12, %7 : vector<8x128xf32>
    %c0_8 = arith.constant 0 : index
    %c0_9 = arith.constant 0 : index
    %c0_10 = arith.constant 0 : index
    %14 = vector.load %arg4[%c0_8, %c0_9, %c0_10] : memref<1x8x128xf32, #tpu.memory_space<vmem>>, vector<1x8x128xf32>
    %15 = vector.shape_cast %14 : vector<1x8x128xf32> to vector<8x128xf32>
    %16 = vector.shape_cast %13 : vector<8x128xf32> to vector<1x8x128xf32>
    tpu.vector_store %arg4[%c0_8, %c0_9, %c0_10], %16 {strides = array<i32>} : memref<1x8x128xf32, #tpu.memory_space<vmem>>, vector<1x8x128xf32>,
    %c0_11 = arith.constant 0 : index
    %c0_12 = arith.constant 0 : index
    %c0_13 = arith.constant 0 : index
    %17 = vector.load %arg5[%c0_11, %c0_12, %c0_13] : memref<1x8x128xf32, #tpu.memory_space<vmem>>, vector<1x8x128xf32>
    %18 = vector.shape_cast %17 : vector<1x8x128xf32> to vector<8x128xf32>
    %19 = arith.addf %18, %10 : vector<8x128xf32>
    %c0_14 = arith.constant 0 : index
    %c0_15 = arith.constant 0 : index
    %c0_16 = arith.constant 0 : index
    %20 = vector.load %arg5[%c0_14, %c0_15, %c0_16] : memref<1x8x128xf32, #tpu.memory_space<vmem>>, vector<1x8x128xf32>
    %21 = vector.shape_cast %20 : vector<1x8x128xf32> to vector<8x128xf32>
    %22 = vector.shape_cast %19 : vector<8x128xf32> to vector<1x8x128xf32>
    tpu.vector_store %arg5[%c0_14, %c0_15, %c0_16], %22 {strides = array<i32>} : memref<1x8x128xf32, #tpu.memory_space<vmem>>, vector<1x8x128xf32>,
    return
  }
  func.func @transform_0(%arg0: i32, %arg1: i32) -> (i32, i32) {
    %c1_i32 = arith.constant 1 : i32
    %0 = arith.muli %arg0, %c1_i32 : i32
    %1 = arith.addi %0, %arg1 : i32
    %c0_i32 = arith.constant 0 : i32
    %2 = arith.minsi %1, %c0_i32 : i32
    %c0_i32_0 = arith.constant 0 : i32
    %c0_i32_1 = arith.constant 0 : i32
    return %2, %c0_i32_0 : i32, i32
  }
  func.func @transform_1(%arg0: i32, %arg1: i32) -> (i32, i32) {
    %c1_i32 = arith.constant 1 : i32
    %0 = arith.muli %arg0, %c1_i32 : i32
    %1 = arith.addi %0, %arg1 : i32
    %c0_i32 = arith.constant 0 : i32
    %2 = arith.minsi %1, %c0_i32 : i32
    %c0_i32_0 = arith.constant 0 : i32
    %c0_i32_1 = arith.constant 0 : i32
    return %2, %c0_i32_0 : i32, i32
  }
  func.func @transform_2(%arg0: i32, %arg1: i32) -> (i32, i32, i32) {
    %c0_i32 = arith.constant 0 : i32
    %c0_i32_0 = arith.constant 0 : i32
    %c0_i32_1 = arith.constant 0 : i32
    return %arg0, %c0_i32, %c0_i32_0 : i32, i32, i32
  }
  func.func @transform_3(%arg0: i32, %arg1: i32) -> (i32, i32, i32) {
    %c0_i32 = arith.constant 0 : i32
    %c0_i32_0 = arith.constant 0 : i32
    %c0_i32_1 = arith.constant 0 : i32
    return %arg0, %c0_i32, %c0_i32_0 : i32, i32, i32
  }
}

</mosaic_0001>

<bundles_post_ra>
// kernel: tpu_custom_call.1
= control target key start
LH: loop header
LB: loop body
LE: loop exit
PB: predicated region body
PF: predicated region fallthrough
CT: control target
= control target key end

     0   :  { %9 = vsyncpa [#allocation3], 0  ;;  %s296_s0 = inlined_call_operand.hbm [shape: f32[16,128], index: 0, kind: input, shape index: {}]   ;;  %s297_s1 = inlined_call_operand.hbm [shape: f32[16,128], index: 1, kind: input, shape index: {}]   ;;  %s298_s2 = inlined_call_operand.hbm [shape: f32[1,8,128], index: 2, kind: output, shape index: {0}]   ;;  %s299_s3 = inlined_call_operand.hbm [shape: f32[1,8,128], index: 3, kind: output, shape index: {1}]  }
   0x1   :  { %10 = vsyncpa [#allocation6], 0 }
   0x2   :  { %11 = vsyncpa [#allocation4], 0 }
   0x3   :  { %12 = vsyncpa [#allocation9], 0  ;;  %s222_s12 = smov [#allocation2]   ;;  %s126_s16 = scalar_lea.hbm %s296_s0, 256 }
   0x4   :  { %s24_s13 = sshll.u32 %s222_s12, 4  ;;  %p127_p0 = scmp.ne.s32.totalorder %s296_s0, %s126_s16  ;;  %s25_s13 = int_to_ptr.vmem [resolvable:$true] %s24_s13 }
   0x5   :  { %p130_p1 = scmp.lt.u32.totalorder %s126_s16, %s296_s0 }
   0x7   :  { %p132_p2 = pnand %p130_p1, %p127_p0 }
   0x9   :  { %135 = shalt.err (!%p132_p2)
}
   0xa   :  { %s136_s21 = scalar_lea.vmem %s25_s13, 256  ;;  %p141_p4 = scmp.lt.s32.totalorder %s25_s13, %s25_s13 }
   0xb   :  { %p137_p3 = scmp.ne.s32.totalorder %s25_s13, %s136_s21  ;;  %p142_p5 = scmp.lt.s32.totalorder %s136_s21, %s136_s21 }
   0xd   :  { %p143_p6 = por %p142_p5, %p141_p4 }
   0xf   :  { %p144_p7 = pnand %p143_p6, %p137_p3 }
  0x11   :  { %147 = shalt.err (!%p144_p7)
}
  0x12   :  { %s223_s22 = smov 128   ;;  %s224_s23 = smov 8  }
  0x13   :  { %30 = dma.hbm_to_vmem [thread:$0]  %s296_s0, 256, %s25_s13, [#allocation3], %s223_s22, %s223_s22, %s224_s23  }
  0x14   :  { %s225_s26 = smov [#allocation5]   ;;  %s148_s30 = scalar_lea.hbm %s297_s1, 256 }
  0x15   :  { %s42_s27 = sshll.u32 %s225_s26, 4  ;;  %p149_p8 = scmp.ne.s32.totalorder %s297_s1, %s148_s30  ;;  %s43_s27 = int_to_ptr.vmem [resolvable:$true] %s42_s27 }
  0x16   :  { %p152_p9 = scmp.lt.u32.totalorder %s148_s30, %s297_s1 }
  0x18   :  { %p154_p10 = pnand %p152_p9, %p149_p8 }
  0x1a   :  { %157 = shalt.err (!%p154_p10)
}
  0x1b   :  { %s158_s8 = scalar_lea.vmem %s43_s27, 256  ;;  %p163_p12 = scmp.lt.s32.totalorder %s43_s27, %s43_s27 }
  0x1c   :  { %p159_p11 = scmp.ne.s32.totalorder %s43_s27, %s158_s8  ;;  %p164_p13 = scmp.lt.s32.totalorder %s158_s8, %s158_s8 }
  0x1e   :  { %p165_p0 = por %p164_p13, %p163_p12 }
  0x20   :  { %p166_p1 = pnand %p165_p0, %p159_p11 }
  0x22   :  { %169 = shalt.err (!%p166_p1)
}
  0x23   :  { %48 = dma.hbm_to_vmem [thread:$0]  %s297_s1, 256, %s43_s27, [#allocation6], %s223_s22, %s223_s22, %s224_s23  }
  0x24   :  { %214 = dma.done.wait [#allocation3], 256  }
  0x25   :  { %215 = vsyncadd [#allocation3], 4294967040 }
  0x26   :  { %216 = dma.done.wait [#allocation6], 256  }
  0x27   :  { %217 = vsyncadd [#allocation6], 4294967040  ;;  %v69_v0 = vld [vmem:[#allocation2] sm:$0xff]  ;;  %v70_v1 = vld [vmem:[#allocation2 + $0x8] sm:$0xff]  ;;  %s226_s10 = smov [#allocation7]   ;;  %s227_s12 = smov [#allocation8]  }
  0x28   :  { %v71_v2 = vld [vmem:[#allocation5] sm:$0xff]  ;;  %v72_v3 = vld [vmem:[#allocation5 + $0x8] sm:$0xff]  ;;  %s91_s11 = sshll.u32 %s226_s10, 4  ;;  %s101_s13 = sshll.u32 %s227_s12, 4  ;;  %s92_s11 = int_to_ptr.vmem [resolvable:$true] %s91_s11  ;;  %s102_s13 = int_to_ptr.vmem [resolvable:$true] %s101_s13 }
  0x29   :  { %v73_v4 = vmul.f32 %v71_v2, %v69_v0  ;;  %v76_v5 = vadd.f32 %v71_v2, %v69_v0  ;;  %v74_v6 = vmul.f32 %v72_v3, %v70_v1  ;;  %v77_v7 = vadd.f32 %v72_v3, %v70_v1  ;;  %s170_s1 = scalar_lea.vmem %s92_s11, 128  ;;  %p175_p3 = scmp.lt.s32.totalorder %s92_s11, %s92_s11 }
  0x2a   :  { %p171_p2 = scmp.ne.s32.totalorder %s92_s11, %s170_s1  ;;  %p176_p4 = scmp.lt.s32.totalorder %s170_s1, %s170_s1 }
  0x2b   :  { %v75_v8 = vadd.f32 %v74_v6, %v73_v4  ;;  %v78_v9 = vadd.f32 %v77_v7, %v76_v5 }
  0x2c   :  { %p177_p5 = por %p176_p4, %p175_p3 }
  0x2d   :  { %81 = vst [vmem:[#allocation7] sm:$0xff] %v75_v8  ;;  %84 = vst [vmem:[#allocation8] sm:$0xff] %v78_v9 }
  0x2e   :  { %p178_p6 = pnand %p177_p5, %p171_p2 }
  0x30   :  { %181 = shalt.err (!%p178_p6)
}
  0x31   :  { %s182_s16 = scalar_lea.hbm %s298_s2, 128 }
  0x32   :  { %p183_p7 = scmp.ne.s32.totalorder %s298_s2, %s182_s16  ;;  %p186_p8 = scmp.lt.u32.totalorder %s182_s16, %s298_s2 }
  0x34   :  { %p188_p9 = pnand %p186_p8, %p183_p7 }
  0x36   :  { %191 = shalt.err (!%p188_p9)
}
  0x37   :  { %94 = dma.vmem_to_hbm [thread:$0]  %s92_s11, 128, %s298_s2, [#allocation4]  }
  0x38   :  { %s192_s23 = scalar_lea.vmem %s102_s13, 128  ;;  %p197_p11 = scmp.lt.s32.totalorder %s102_s13, %s102_s13 }
  0x39   :  { %p193_p10 = scmp.ne.s32.totalorder %s102_s13, %s192_s23  ;;  %p198_p12 = scmp.lt.s32.totalorder %s192_s23, %s192_s23 }
  0x3b   :  { %p199_p13 = por %p198_p12, %p197_p11 }
  0x3d   :  { %p200_p0 = pnand %p199_p13, %p193_p10 }
  0x3f   :  { %203 = shalt.err (!%p200_p0)
}
  0x40   :  { %s204_s26 = scalar_lea.hbm %s299_s3, 128 }
  0x41   :  { %p205_p1 = scmp.ne.s32.totalorder %s299_s3, %s204_s26  ;;  %p208_p2 = scmp.lt.u32.totalorder %s204_s26, %s299_s3 }
  0x43   :  { %p210_p3 = pnand %p208_p2, %p205_p1 }
  0x45   :  { %213 = shalt.err (!%p210_p3)
}
  0x46   :  { %104 = dma.vmem_to_hbm [thread:$0]  %s102_s13, 128, %s299_s3, [#allocation9]  }
  0x47   :  { %218 = dma.done.wait [#allocation4], 128  }
  0x48   :  { %219 = vsyncadd [#allocation4], 4294967168 }
  0x49   :  { %220 = dma.done.wait [#allocation9], 128  }
  0x4a   :  { %221 = vsyncadd [#allocation9], 4294967168 }
  0x4b   :  { %111 = vsyncpa [#allocation3], 1 }
  0x4c   :  { %112 = vsyncpa [#allocation6], 1 }
  0x4d   :  { %113 = vsyncpa [#allocation4], 1 }
  0x4e   :  { %114 = vsyncpa [#allocation9], 1 }

</bundles_post_ra>
